<compile_context>
chip_gen: v7x
topology: tpu7x:2x2x1
jax: 0.10.0
libtpu: 0.0.40
codegen_flags: <defaults>
</compile_context>

<pallas_src>
import functools

import numpy as np
import jax
import jax.numpy as jnp
from jax.experimental import pallas as pl
from jax.experimental.pallas import tpu as pltpu

LANE = 128       # pad feature dims to multiples of the lane width (128 on all chips)
SUBLANE = 8      # batch tile must be a multiple of the sublane width
VMEM_LIMIT_BYTES = 48 * 1024 * 1024       # scoped VMEM limit; safe under v7x's 64 MiB
RESIDENT_BUDGET_BYTES = 40 * 1024 * 1024  # budget for VMEM-resident weights + buffers


def _round_up(x, m):
    return ((x + m - 1) // m) * m


def _cdiv(a, b):
    return -(-a // b)


# ----------------------------------------------------------------------------
# Mask construction — exact reproduction of MADE.update_masks() (numpy, seed=0)
# ----------------------------------------------------------------------------
def build_made_masks(nin, hidden_sizes, nout, seed=0, natural_ordering=True):
    L = len(hidden_sizes)
    rng = np.random.RandomState(seed)
    m = {}
    m[-1] = np.arange(nin) if natural_ordering else rng.permutation(nin)
    for l in range(L):
        m[l] = rng.randint(m[l - 1].min(), nin - 1, size=hidden_sizes[l])
    masks = [m[l - 1][:, None] <= m[l][None, :] for l in range(L)]
    masks.append(m[L - 1][:, None] < m[-1][None, :])
    if nout > nin:
        k = int(nout / nin)
        masks[-1] = np.concatenate([masks[-1]] * k, axis=1)
    # masks[i] has shape (in_features_i, out_features_i)
    return [msk.astype(np.float32) for msk in masks]


# ----------------------------------------------------------------------------
# One-time parameter preparation (hoisted out of the per-call forward path)
# ----------------------------------------------------------------------------
def prepare_made_params(weights_eff, biases, *, pad_to=LANE, compute_dtype=jnp.bfloat16):
    """Pad masked weights to lane-aligned (in_p, out_p) bf16 slabs and consolidate biases
    into a single (num_layers, 1, Fmax) f32 operand.  Zero padding is mathematically inert
    (zeros through matmul, zero bias, ReLU(0)=0).  Call once per parameter/mask update."""
    num_layers = len(weights_eff)
    dims = [int(weights_eff[0].shape[0])] + [int(w.shape[1]) for w in weights_eff]
    dims_p = [_round_up(d, pad_to) for d in dims]

    w_padded = []
    for i, w in enumerate(weights_eff):
        wp = jnp.zeros((dims_p[i], dims_p[i + 1]), compute_dtype)
        wp = wp.at[:dims[i], :dims[i + 1]].set(jnp.asarray(w, compute_dtype))
        w_padded.append(wp)

    f_max = max(dims_p[1:])
    b_all = jnp.zeros((num_layers, 1, f_max), jnp.float32)
    for i, b in enumerate(biases):
        b_all = b_all.at[i, 0, :dims[i + 1]].set(
            jnp.reshape(b, (-1,)).astype(jnp.float32))
    return tuple(w_padded), b_all


# ----------------------------------------------------------------------------
# Pallas kernel: full masked-MLP (MaskedLinear + ReLU ... + MaskedLinear)
# ----------------------------------------------------------------------------
def _made_mlp_kernel(num_layers, *refs):
    # refs = (x_ref, w_1..w_L, b_all_ref, o_ref)
    x_ref = refs[0]
    w_refs = refs[1:1 + num_layers]
    b_ref = refs[1 + num_layers]          # (num_layers, 1, Fmax) f32, zero-padded
    o_ref = refs[2 + num_layers]

    h = x_ref[...]                        # (TB, in_p) bf16
    for i, w_ref in enumerate(w_refs):
        out_p = w_ref.shape[1]            # static, multiple of 128
        acc = jnp.dot(h, w_ref[...], preferred_element_type=jnp.float32)
        acc = acc + b_ref[i, :, :out_p]   # (1, out_p) f32 tile, broadcast over TB rows
        if i < num_layers - 1:
            h = jnp.maximum(acc, 0.0).astype(x_ref.dtype)   # ReLU in f32, carry bf16
        else:
            o_ref[...] = acc.astype(o_ref.dtype)            # final layer: no ReLU


def _choose_batch_tiling(B, tb_max, min_tiles):
    """Pick (TB, Bp, n_tiles): >= min_tiles evenly sized tiles (v7x megacore), TB a
    multiple of SUBLANE and <= tb_max, minimizing tail padding."""
    n = max(min_tiles, _cdiv(B, tb_max))
    tb = min(tb_max, _round_up(_cdiv(B, n), SUBLANE))
    n = max(1, _cdiv(B, tb))              # re-derive: rounding TB up may need fewer tiles
    return tb, tb * n, n


@functools.partial(
    jax.jit,
    static_argnames=("nin", "nout", "tb_max", "min_batch_tiles", "out_dtype",
                     "x_buffering"))
def made_forward_pallas(x, w_padded, b_all, *, nin, nout, tb_max=1024,
                        min_batch_tiles=2, out_dtype=jnp.float32, x_buffering=2):
    """x: [B, nin] f32; w_padded/b_all from prepare_made_params().  Returns [B, nout]."""
    num_layers = len(w_padded)
    compute_dtype = w_padded[0].dtype
    B = x.shape[0]
    in_p = w_padded[0].shape[0]
    nout_p = w_padded[-1].shape[1]

    TB, Bp, n_tiles = _choose_batch_tiling(B, tb_max, min_batch_tiles)

    # VMEM residency gate: all weights stay resident only if they (plus the
    # double-buffered x / out tiles) fit a v7x-safe budget (64 MiB physical VMEM).
    resident = sum(int(np.prod(w.shape)) * w.dtype.itemsize for w in w_padded)
    resident += int(np.prod(b_all.shape)) * b_all.dtype.itemsize
    streamed = (2 * TB * in_p * np.dtype(compute_dtype).itemsize
                + 2 * TB * nout_p * np.dtype(out_dtype).itemsize)
    if resident + streamed > RESIDENT_BUDGET_BYTES:
        # TODO(synk): add a weight-streaming variant (per-layer / K-reduction grid axis
        # with f32 accumulator scratch) for hidden sizes whose weights exceed VMEM.
        raise NotImplementedError(
            "MADE weights too large for the all-resident-VMEM strategy "
            f"({resident + streamed} bytes > {RESIDENT_BUDGET_BYTES}); "
            "needs a weight-streaming kernel variant.")

    # Pad/cast x only when needed; this runs under the same jit as the pallas_call so it
    # fuses into a single pad op instead of a separate HBM round trip per call.
    xc = x.astype(compute_dtype)
    if Bp != B or in_p != nin:
        xc = jnp.pad(xc, ((0, Bp - B), (0, in_p - nin)))

    if x_buffering and x_buffering > 2:
        # Deeper buffering on the streamed operand only (use if the x DMA is exposed).
        x_spec = pl.BlockSpec((TB, in_p), lambda i: (i, 0),
                              pipeline_mode=pl.Buffered(x_buffering))
    else:
        x_spec = pl.BlockSpec((TB, in_p), lambda i: (i, 0))

    in_specs = [x_spec]
    # Weights/biases: same block every iteration -> stay VMEM-resident across the grid.
    in_specs += [pl.BlockSpec(w.shape, lambda i: (0, 0)) for w in w_padded]
    in_specs += [pl.BlockSpec(b_all.shape, lambda i: (0, 0, 0))]
    out_specs = pl.BlockSpec((TB, nout_p), lambda i: (i, 0))

    out_padded = pl.pallas_call(
        functools.partial(_made_mlp_kernel, num_layers),
        out_shape=jax.ShapeDtypeStruct((Bp, nout_p), out_dtype),
        grid=(n_tiles,),
        in_specs=in_specs,
        out_specs=out_specs,
        compiler_params=pltpu.CompilerParams(
            dimension_semantics=("parallel",),       # >=2 batch tiles -> both v7x TCs
            vmem_limit_bytes=VMEM_LIMIT_BYTES),
    )(xc, *w_padded, b_all)

    return out_padded[:B, :nout]


# ----------------------------------------------------------------------------
# Parameter setup (deterministic, in-script) + reference check
# ----------------------------------------------------------------------------
def init_made_params(key, nin, hidden_sizes, nout):
    """Deterministic init mimicking nn.Linear's uniform(-1/sqrt(fan_in), 1/sqrt(fan_in)).
    Weights returned already transposed to (in, out)."""
    hs = [nin] + list(hidden_sizes) + [nout]
    weights, biases = [], []
    for h0, h1 in zip(hs, hs[1:]):
        key, kw, kb = jax.random.split(key, 3)
        bound = 1.0 / np.sqrt(h0)
        w = jax.random.uniform(kw, (h0, h1), jnp.float32, -bound, bound)   # (in, out)
        b = jax.random.uniform(kb, (1, h1), jnp.float32, -bound, bound)    # (1, out)
        weights.append(w)
        biases.append(b)
    return weights, biases


def made_forward_ref(x, weights_eff, biases, compute_dtype=jnp.bfloat16):
    """Pure-JAX reference mirroring the kernel's precision (bf16 operands, f32 accum)."""
    n = len(weights_eff)
    h = x.astype(compute_dtype)
    out = None
    for i, (w, b) in enumerate(zip(weights_eff, biases)):
        acc = jnp.dot(h, w.astype(compute_dtype),
                      preferred_element_type=jnp.float32)
        acc = acc + b.astype(jnp.float32).reshape(1, -1)
        if i < n - 1:
            h = jnp.maximum(acc, 0.0).astype(compute_dtype)
        else:
            out = acc
    return out


if __name__ == "__main__":
    # Small shapes consistent with the module: nout must be an integer multiple of nin.
    nin = 16
    hidden_sizes = [32, 32]
    nout = 2 * nin      # e.g. two distribution parameters per input dim
    batch = 32          # >= 2 batch tiles so the "parallel" axis can use both v7x TCs

    key = jax.random.PRNGKey(0)
    key, kx = jax.random.split(key)
    x = jax.random.normal(kx, (batch, nin), jnp.float32)

    # Parameters + autoregressive masks (exactly as update_masks() with seed=0).
    weights, biases = init_made_params(key, nin, hidden_sizes, nout)
    masks = build_made_masks(nin, hidden_sizes, nout, seed=0, natural_ordering=True)

    # Effective masked weights (what MaskedLinear.forward multiplies by).
    weights_eff = [w * jnp.asarray(m) for w, m in zip(weights, masks)]

    # One-time padding / bf16 cast (hoisted out of the per-call forward path).
    w_padded, b_all = prepare_made_params(weights_eff, biases)

    out = made_forward_pallas(x, w_padded, b_all, nin=nin, nout=nout)
    out = jax.block_until_ready(out)

    # Sanity check against a pure-JAX reference with matching precision.
    ref = made_forward_ref(x, weights_eff, biases)
    np.testing.assert_allclose(np.asarray(out), np.asarray(ref), rtol=1e-3, atol=1e-3)

    # TODO(synk): backward-hook NaN/Inf gradient zeroing in forward() has no forward-pass
    # Pallas equivalent (it only affects autograd), so it is intentionally omitted.

    print("KERNEL_OK")
</pallas_src>

<mosaic_0001>
module attributes {stable_mosaic.version = 11 : i64} {
  func.func @_made_mlp_kernel(%arg0: i32, %arg1: memref<16x128xbf16, #tpu.memory_space<vmem>>, %arg2: memref<128x128xbf16, #tpu.memory_space<vmem>>, %arg3: memref<128x128xbf16, #tpu.memory_space<vmem>>, %arg4: memref<128x128xbf16, #tpu.memory_space<vmem>>, %arg5: memref<3x1x128xf32, #tpu.memory_space<vmem>>, %arg6: memref<16x128xf32, #tpu.memory_space<vmem>>) attributes {dimension_semantics = [#tpu.dimension_semantics<parallel>], iteration_bounds = array<i64: 2>, scalar_prefetch = 0 : i64, scratch_operands = 0 : i64, tpu.core_type = #tpu.core_type<tc>, window_params = [{transform_indices = @transform_0, window_bounds = array<i64: 16, 128>}, {pipeline_mode = #tpu.pipeline_mode<synchronous>, transform_indices = @transform_1, window_bounds = array<i64: 128, 128>}, {pipeline_mode = #tpu.pipeline_mode<synchronous>, transform_indices = @transform_2, window_bounds = array<i64: 128, 128>}, {pipeline_mode = #tpu.pipeline_mode<synchronous>, transform_indices = @transform_3, window_bounds = array<i64: 128, 128>}, {pipeline_mode = #tpu.pipeline_mode<synchronous>, transform_indices = @transform_4, window_bounds = array<i64: 3, 1, 128>}, {transform_indices = @transform_5, window_bounds = array<i64: 16, 128>}]} {
    %c0 = arith.constant 0 : index
    %c0_0 = arith.constant 0 : index
    %0 = vector.load %arg1[%c0, %c0_0] : memref<16x128xbf16, #tpu.memory_space<vmem>>, vector<16x128xbf16>
    %c0_1 = arith.constant 0 : index
    %c0_2 = arith.constant 0 : index
    %1 = vector.load %arg2[%c0_1, %c0_2] : memref<128x128xbf16, #tpu.memory_space<vmem>>, vector<128x128xbf16>
    %cst = arith.constant dense<0.000000e+00> : vector<16x128xf32>
    %2 = tpu.matmul %0, %1, %cst {dimension_numbers = #tpu.dot_dimension_numbers<[1], [0], [0], [1], [0, 0, 1, 1], [], []>} : vector<16x128xbf16>, vector<128x128xbf16>, vector<16x128xf32> -> vector<16x128xf32>
    %c0_3 = arith.constant 0 : index
    %c0_4 = arith.constant 0 : index
    %c0_5 = arith.constant 0 : index
    %3 = vector.load %arg5[%c0_3, %c0_4, %c0_5] : memref<3x1x128xf32, #tpu.memory_space<vmem>>, vector<1x1x128xf32>
    %4 = vector.shape_cast %3 : vector<1x1x128xf32> to vector<1x128xf32>
    %5 = vector.broadcast %4 : vector<1x128xf32> to vector<16x128xf32>
    %6 = arith.addf %2, %5 : vector<16x128xf32>
    %cst_6 = arith.constant 0.000000e+00 : f32
    %7 = vector.broadcast %cst_6 : f32 to vector<16x128xf32>
    %8 = arith.maximumf %6, %7 : vector<16x128xf32>
    %9 = arith.truncf %8 : vector<16x128xf32> to vector<16x128xbf16>
    %c0_7 = arith.constant 0 : index
    %c0_8 = arith.constant 0 : index
    %10 = vector.load %arg3[%c0_7, %c0_8] : memref<128x128xbf16, #tpu.memory_space<vmem>>, vector<128x128xbf16>
    %cst_9 = arith.constant dense<0.000000e+00> : vector<16x128xf32>
    %11 = tpu.matmul %9, %10, %cst_9 {dimension_numbers = #tpu.dot_dimension_numbers<[1], [0], [0], [1], [0, 0, 1, 1], [], []>} : vector<16x128xbf16>, vector<128x128xbf16>, vector<16x128xf32> -> vector<16x128xf32>
    %c1 = arith.constant 1 : index
    %c0_10 = arith.constant 0 : index
    %c0_11 = arith.constant 0 : index
    %12 = vector.load %arg5[%c1, %c0_10, %c0_11] : memref<3x1x128xf32, #tpu.memory_space<vmem>>, vector<1x1x128xf32>
    %13 = vector.shape_cast %12 : vector<1x1x128xf32> to vector<1x128xf32>
    %14 = vector.broadcast %13 : vector<1x128xf32> to vector<16x128xf32>
    %15 = arith.addf %11, %14 : vector<16x128xf32>
    %cst_12 = arith.constant 0.000000e+00 : f32
    %16 = vector.broadcast %cst_12 : f32 to vector<16x128xf32>
    %17 = arith.maximumf %15, %16 : vector<16x128xf32>
    %18 = arith.truncf %17 : vector<16x128xf32> to vector<16x128xbf16>
    %c0_13 = arith.constant 0 : index
    %c0_14 = arith.constant 0 : index
    %19 = vector.load %arg4[%c0_13, %c0_14] : memref<128x128xbf16, #tpu.memory_space<vmem>>, vector<128x128xbf16>
    %cst_15 = arith.constant dense<0.000000e+00> : vector<16x128xf32>
    %20 = tpu.matmul %18, %19, %cst_15 {dimension_numbers = #tpu.dot_dimension_numbers<[1], [0], [0], [1], [0, 0, 1, 1], [], []>} : vector<16x128xbf16>, vector<128x128xbf16>, vector<16x128xf32> -> vector<16x128xf32>
    %c2 = arith.constant 2 : index
    %c0_16 = arith.constant 0 : index
    %c0_17 = arith.constant 0 : index
    %21 = vector.load %arg5[%c2, %c0_16, %c0_17] : memref<3x1x128xf32, #tpu.memory_space<vmem>>, vector<1x1x128xf32>
    %22 = vector.shape_cast %21 : vector<1x1x128xf32> to vector<1x128xf32>
    %23 = vector.broadcast %22 : vector<1x128xf32> to vector<16x128xf32>
    %24 = arith.addf %20, %23 : vector<16x128xf32>
    %c0_18 = arith.constant 0 : index
    %c0_19 = arith.constant 0 : index
    %25 = vector.load %arg6[%c0_18, %c0_19] : memref<16x128xf32, #tpu.memory_space<vmem>>, vector<16x128xf32>
    tpu.vector_store %arg6[%c0_18, %c0_19], %24 {strides = array<i32>} : memref<16x128xf32, #tpu.memory_space<vmem>>, vector<16x128xf32>,
    return
  }
  func.func @transform_0(%arg0: i32) -> (i32, i32) {
    %c0_i32 = arith.constant 0 : i32
    %c0_i32_0 = arith.constant 0 : i32
    return %arg0, %c0_i32 : i32, i32
  }
  func.func @transform_1(%arg0: i32) -> (i32, i32) {
    %c0_i32 = arith.constant 0 : i32
    %c0_i32_0 = arith.constant 0 : i32
    %c0_i32_1 = arith.constant 0 : i32
    return %c0_i32, %c0_i32_0 : i32, i32
  }
  func.func @transform_2(%arg0: i32) -> (i32, i32) {
    %c0_i32 = arith.constant 0 : i32
    %c0_i32_0 = arith.constant 0 : i32
    %c0_i32_1 = arith.constant 0 : i32
    return %c0_i32, %c0_i32_0 : i32, i32
  }
  func.func @transform_3(%arg0: i32) -> (i32, i32) {
    %c0_i32 = arith.constant 0 : i32
    %c0_i32_0 = arith.constant 0 : i32
    %c0_i32_1 = arith.constant 0 : i32
    return %c0_i32, %c0_i32_0 : i32, i32
  }
  func.func @transform_4(%arg0: i32) -> (i32, i32, i32) {
    %c0_i32 = arith.constant 0 : i32
    %c0_i32_0 = arith.constant 0 : i32
    %c0_i32_1 = arith.constant 0 : i32
    %c0_i32_2 = arith.constant 0 : i32
    return %c0_i32, %c0_i32_0, %c0_i32_1 : i32, i32, i32
  }
  func.func @transform_5(%arg0: i32) -> (i32, i32) {
    %c0_i32 = arith.constant 0 : i32
    %c0_i32_0 = arith.constant 0 : i32
    return %arg0, %c0_i32 : i32, i32
  }
}

</mosaic_0001>

<bundles_post_ra>
// kernel: made_forward_pallas.1
= control target key start
LH: loop header
LB: loop body
LE: loop exit
PB: predicated region body
PF: predicated region fallthrough
CT: control target
= control target key end

     0   :  { %10 = vsyncpa [#allocation3], 0  ;;  %s1341_s0 = inlined_call_operand.vmem [shape: bf16[32,128], index: 0, kind: input, shape index: {}]   ;;  %s1342_s1 = inlined_call_operand.vmem [shape: bf16[128,128], index: 1, kind: input, shape index: {}]   ;;  %s1343_s2 = inlined_call_operand.hbm [shape: bf16[128,128], index: 2, kind: input, shape index: {}]   ;;  %s1344_s3 = inlined_call_operand.hbm [shape: bf16[128,128], index: 3, kind: input, shape index: {}]   ;;  %s1345_s4 = inlined_call_operand.vmem [shape: f32[3,1,128], index: 4, kind: input, shape index: {}]   ;;  %s1346_s5 = inlined_call_operand.hbm [shape: f32[32,128], index: 5, kind: output, shape index: {}]  }
   0x1   :  { %11 = vsyncpa [#allocation6], 0 }
   0x2   :  { %12 = vsyncpa [#allocation4], 0 }
   0x3   :  { %14 = vsyncpa [#allocation4 + $0x1], 0  ;;  %s1101_s18 = smov 0   ;;  %s1103_s19 = smov 0  }
   0x4   :  { %s1105_s20 = smov 0   ;;  %s1107_s21 = smov 0  }
   0x5 LB: > { %s1122_s22 = sadd.s32 4294967295, %s1060_s21   ;;  %s709_s23 = sadd.s32 4294967294, %s1060_s21   ;;  %s1060_s21 = sphi %s1107_s21, %s1364_s21   ;;  %s1056_s20 = sphi %s1105_s20, %s1363_s20   ;;  %s1052_s19 = sphi %s1103_s19, %s1362_s19   ;;  %s1048_s18 = sphi %s1101_s18, %s1361_s18  }
   0x6   : > { %s1126_s24 = sadd.s32 1, %s1060_s21   ;;  %s137_s25 = sadd.s32 1, %s1056_s20 }
   0x7   : > { %s134_s26 = ssub.s32 %s1060_s21, %s1126_s24  ;;  %p147_p0 = scmp.ne.s32.totalorder %s1056_s20, %s1052_s19 }
   0x8   : > { %p135_p1 = scmp.eq.s32.totalorder %s134_s26, 0  ;;  %p148_p2 = scmp.eq.s32.totalorder %s1122_s22, 1 }
   0x9   : > { %p153_p3 = scmp.ne.s32.totalorder %s1052_s19, %s1048_s18  ;;  %p154_p4 = scmp.eq.s32.totalorder %s709_s23, 1 }
   0xa   : > { %s1137_s27 = scalar_select %p135_p1, %s1056_s20, %s137_s25  }
   0xb   : > { %p1139_p5 = por %p148_p2, %p147_p0  ;;  %p1143_p6 = por %p154_p4, %p153_p3 }
   0xc   : > { %p710_p7 = scmp.ge.s32.totalorder %s1060_s21, 1  ;;  %p161_p8 = scmp.lt.s32.totalorder %s1060_s21, 3 }
   0xd   : > { %s1350_s28 = scalar_select %p1139_p5, 1, 0 }
   0xe   : > { %s1351_s29 = scalar_select %p1143_p6, 1, 0 }
   0xf   : > { %p1347_p9 = scmp.eq.s32.totalorder %s1122_s22, 0  ;;  %p1150_p10 = pnand %p710_p7, %p161_p8 }
  0x10   : > { %s1062_s6 = smov [#allocation2]   ;;  %s1063_s9 = smov [#allocation5]  }
  0x11   : > { %s1352_s30 = scalar_select %p1150_p10, 1, 0 }
  0x12   : > { %s176_s7 = sshll.u32 %s1062_s6, 4  ;;  %p853_p11 = pneg %p1150_p10  ;;  %s177_s7 = int_to_ptr.vmem [resolvable:$true] %s176_s7 }
  0x13   : > { %s189_s10 = sshll.u32 %s1063_s9, 4  ;;  %s934_s13 = scalar_lea.hbm %s1343_s2, 1024  ;;  %s1162_s10 = int_to_ptr.vmem [resolvable:$true] %s189_s10 }
  0x14   : > { %p1158_p12 = pnand %p1347_p9, %p853_p11  ;;  %p935_p13 = scmp.ne.s32.totalorder %s1343_s2, %s934_s13 }
  0x15   : > { %p941_p3 = scmp.lt.u32.totalorder %s934_s13, %s1343_s2 }
  0x16   : > { %p936_p0 = pneg %p1158_p12 }
  0x18   : > { %p937_p1 = pnand %p936_p0, %p935_p13 }
  0x1a   : > { %p938_p2 = pneg %p937_p1 }
  0x1c   : > { %p943_p4 = pnand %p941_p3, %p938_p2 }
  0x1e   : > { %946 = shalt.err (!%p943_p4)
}
  0x1f   : > { %s947_s23 = scalar_lea.vmem %s177_s7, 1024  ;;  %p955_p9 = scmp.lt.s32.totalorder %s177_s7, %s177_s7 }
  0x20   : > { %p948_p7 = scmp.ne.s32.totalorder %s177_s7, %s947_s23  ;;  %p956_p6 = scmp.lt.s32.totalorder %s947_s23, %s947_s23 }
  0x22   : > { %p950_p8 = pnand %p948_p7, %p936_p0  ;;  %p957_p5 = por %p956_p6, %p955_p9 }
  0x24   : > { %p951_p11 = pneg %p950_p8 }
  0x26   : > { %p958_p10 = pnand %p957_p5, %p951_p11 }
  0x28   : > { %961 = shalt.err (!%p958_p10)
}
  0x29   : > { %s1064_s25 = smov 64   ;;  %s1065_s26 = smov 4  }
  0x2a   : > { %856 = dma.hbm_to_vmem [thread:$0]  (!%p1158_p12), %s1343_s2, 1024, %s177_s7, [#allocation3], %s1064_s25, %s1064_s25, %s1065_s26  }
  0x2b   : > { %s962_s13 = scalar_lea.hbm %s1344_s3, 1024 }
  0x2c   : > { %p963_p13 = scmp.ne.s32.totalorder %s1344_s3, %s962_s13  ;;  %p969_p9 = scmp.lt.u32.totalorder %s962_s13, %s1344_s3 }
  0x2e   : > { %p965_p5 = pnand %p963_p13, %p936_p0 }
  0x30   : > { %p966_p6 = pneg %p965_p5 }
  0x32   : > { %p971_p10 = pnand %p969_p9, %p966_p6 }
  0x34   : > { %974 = shalt.err (!%p971_p10)
}
  0x35   : > { %s975_s7 = scalar_lea.vmem %s1162_s10, 1024  ;;  %p983_p4 = scmp.lt.s32.totalorder %s1162_s10, %s1162_s10 }
  0x36   : > { %p976_p1 = scmp.ne.s32.totalorder %s1162_s10, %s975_s7  ;;  %p984_p7 = scmp.lt.s32.totalorder %s975_s7, %s975_s7 }
  0x38   : > { %p978_p2 = pnand %p976_p1, %p936_p0  ;;  %p985_p8 = por %p984_p7, %p983_p4 }
  0x3a   : > { %p979_p3 = pneg %p978_p2 }
  0x3c   : > { %p986_p11 = pnand %p985_p8, %p979_p3 }
  0x3e   : > { %989 = shalt.err (!%p986_p11)
}
  0x3f   : > { %859 = dma.hbm_to_vmem [thread:$0]  (!%p1158_p12), %s1344_s3, 1024, %s1162_s10, [#allocation6], %s1064_s25, %s1064_s25, %s1065_s26  }
  0x40   : > { %p1354_p13 = scmp.ne.s32.totalorder %s1352_s30, 0 }
  0x41   : > { %p1355_p5 = scmp.eq.s32.totalorder (!%p1354_p13), %s1122_s22, 0 }
  0x42   : > { %217 = sbr.rel (%p1354_p13) target bundleno = 783 (0x30f), region = 40 }
  0x49   : > { %1035 = dma.done.wait (%p1355_p5), [#allocation3], 1024   ;;  %p1356_p0 = pmov %p1355_p5 }
  0x4b   : > { %1037 = vsyncadd (%p1356_p0), [#allocation3], 4294966272  ;;  %p1357_p6 = pmov %p1356_p0 }
  0x4c   : > { %p1358_p9 = pmov %p1356_p0 }
  0x4d   : > { %1039 = dma.done.wait (%p1357_p6), [#allocation6], 1024  }
  0x4e   : > { %1041 = vsyncadd (%p1358_p9), [#allocation6], 4294966272  ;;  %s718_s8 = sshll.u32 %s1122_s22, 1  ;;  %v1066_v0 = vmov 0.0   ;;  %vm1067_vm0 = vmmov 0   ;;  %v909_v1 = vld [vmem:[%s1342_s1] sm:$0xff]  }
  0x4f   : > { %783 = vmatprep.subr.bf16.mxu0 %v1066_v0  ;;  %799 = vmatprep.mubr.msk.bf16.mxu0 %vm1067_vm0, %v1066_v0  ;;  %p250_p12 = scmp.lt.s32.totalorder %s718_s8, 3  ;;  %v910_v2 = vld [vmem:[%s1342_s1 + $0x8] sm:$0xff]   ;;  %v911_v3 = vld [vmem:[%s1342_s1 + $0x10] sm:$0xff]   ;;  %v918_v4 = vld [vmem:[#allocation2] sm:$0xff]   ;;  %s246_s14 = sand.u32 1, %s1052_s19  }
  0x50   : > { %803 = vmatprep.subr.bf16.mxu1 %v1066_v0  ;;  %819 = vmatprep.mubr.msk.bf16.mxu1 %vm1067_vm0, %v1066_v0  ;;  %v912_v5 = vld [vmem:[%s1342_s1 + $0x18] sm:$0xff]   ;;  %v919_v6 = vld [vmem:[#allocation2 + $0x8] sm:$0xff]   ;;  %v913_v7 = vld [vmem:[%s1342_s1 + $0x20] sm:$0xff]   ;;  %s755_s6 = sshll.u32 %s1122_s22, 8  ;;  %s1300_s25 = scalar_lea.sflag [#allocation4], %s246_s14 }
  0x51   : > { %s1366_s8 = smov (!%p250_p12, %s718_s8), 3  ;;  %784 = vmatpush3.bf16.msra.mxu0 %v909_v1  ;;  %804 = vmatpush3.bf16.msra.mxu1 %v918_v4  ;;  %v920_v8 = vld [vmem:[#allocation2 + $0x10] sm:$0xff]   ;;  %v914_v9 = vld [vmem:[%s1342_s1 + $0x28] sm:$0xff]   ;;  %v921_v10 = vld [vmem:[#allocation2 + $0x18] sm:$0xff]   ;;  %s1298_s10 = scalar_lea.hbm %s1346_s5, %s755_s6 }
  0x52   : > { %785 = vmatprep.subr.bf16.mxu0 %v1066_v0  ;;  %s719_s9 = sshll.u32 %s1366_s8, 2  ;;  %805 = vmatprep.subr.bf16.mxu1 %v1066_v0  ;;  %v915_v11 = vld [vmem:[%s1342_s1 + $0x30] sm:$0xff]   ;;  %v922_v12 = vld [vmem:[#allocation2 + $0x20] sm:$0xff]   ;;  %v916_v13 = vld [vmem:[%s1342_s1 + $0x38] sm:$0xff]   ;;  %p1359_p1 = scmp.ne.s32.totalorder %s1350_s28, 0 }
  0x53   : > { %s1242_s15 = scalar_lea.vmem %s1341_s0, %s719_s9  ;;  %v923_v14 = vld [vmem:[#allocation2 + $0x28] sm:$0xff]   ;;  %v924_v16 = vld [vmem:[#allocation2 + $0x30] sm:$0xff]   ;;  %v925_v17 = vld [vmem:[#allocation2 + $0x38] sm:$0xff]   ;;  %s1068_s26 = smov [#allocation7]  }
  0x54   : > { %v917_v15 = vld [vmem:[%s1242_s15] sm:$0xff]   ;;  %v927_v19 = vld [vmem:[#allocation5 + $0x8] sm:$0xff]   ;;  %v928_v20 = vld [vmem:[#allocation5 + $0x10] sm:$0xff]   ;;  %s717_s15 = sshll.u32 %s246_s14, 4  ;;  %s994_s9 = sshll.u32 %s1068_s26, 4  ;;  %s995_s9 = int_to_ptr.vmem [resolvable:$false] %s994_s9 }
  0x55   : > { %786 = vmatpush3.bf16.msra.mxu0 %v910_v2  ;;  %806 = vmatpush3.bf16.msra.mxu1 %v919_v6  ;;  %v926_v18 = vld [vmem:[#allocation5] sm:$0xff]   ;;  %v929_v21 = vld [vmem:[#allocation5 + $0x18] sm:$0xff]   ;;  %v931_v23 = vld [vmem:[#allocation5 + $0x28] sm:$0xff]   ;;  %s248_s7 = scalar_lea.vmem [#allocation7], %s717_s15  ;;  %s996_s11 = scalar_lea.vmem %s995_s9, 512 }
  0x56   : > { %787 = vmatprep.subr.bf16.mxu0 %v1066_v0  ;;  %807 = vmatprep.subr.bf16.mxu1 %v1066_v0  ;;  %v930_v22 = vld [vmem:[#allocation5 + $0x20] sm:$0xff]   ;;  %v932_v34 = vld [vmem:[#allocation5 + $0x30] sm:$0xff]   ;;  %v933_v35 = vld [vmem:[#allocation5 + $0x38] sm:$0xff]   ;;  %s625_s23 = sshll.u32 %s248_s7, 4  ;;  %s1293_s23 = int_to_ptr.vmem [resolvable:$true] %s625_s23 }
  0x57   : > { %v720_v24 = vld [vmem:[%s1345_s4] ss:$0 sm:$0xff]  ;;  %v731_v36 = vld [vmem:[%s1345_s4 + $0x1] ss:$0 sm:$0xff]  ;;  %v741_v46 = vld [vmem:[%s1345_s4 + $0x2] ss:$0 sm:$0xff]  ;;  %p997_p4 = scmp.lt.s32.totalorder %s1293_s23, %s995_s9 }
  0x58   : > { %s990_s22 = scalar_lea.vmem %s1293_s23, 256 }
  0x59   : > { %788 = vmatpush3.bf16.msra.mxu0 %v911_v3  ;;  %808 = vmatpush3.bf16.msra.mxu1 %v920_v8  ;;  %p991_p10 = scmp.ne.s32.totalorder %s1293_s23, %s990_s22  ;;  %p998_p7 = scmp.lt.s32.totalorder %s996_s11, %s990_s22 }
  0x5a   : > { %789 = vmatprep.subr.bf16.mxu0 %v1066_v0  ;;  %809 = vmatprep.subr.bf16.mxu1 %v1066_v0 }
  0x5b   : > { %p992_p2 = pnand %p991_p10, %p1359_p1  ;;  %p999_p8 = por %p998_p7, %p997_p4 }
  0x5d   : > { %790 = vmatpush3.bf16.msra.mxu0 %v912_v5  ;;  %810 = vmatpush3.bf16.msra.mxu1 %v921_v10  ;;  %p993_p3 = pneg %p992_p2 }
  0x5e   : > { %791 = vmatprep.subr.bf16.mxu0 %v1066_v0  ;;  %811 = vmatprep.subr.bf16.mxu1 %v1066_v0 }
  0x5f   : > { %p1000_p11 = pnand %p999_p8, %p993_p3 }
  0x61   : > { %792 = vmatpush3.bf16.msra.mxu0 %v913_v7  ;;  %812 = vmatpush3.bf16.msra.mxu1 %v922_v12 }
  0x62   : > { %793 = vmatprep.subr.bf16.mxu0 %v1066_v0  ;;  %813 = vmatprep.subr.bf16.mxu1 %v1066_v0 }
  0x65   : > { %794 = vmatpush3.bf16.msra.mxu0 %v914_v9  ;;  %814 = vmatpush3.bf16.msra.mxu1 %v923_v14 }
  0x66   : > { %795 = vmatprep.subr.bf16.mxu0 %v1066_v0  ;;  %815 = vmatprep.subr.bf16.mxu1 %v1066_v0 }
  0x69   : > { %796 = vmatpush3.bf16.msra.mxu0 %v915_v11  ;;  %816 = vmatpush3.bf16.msra.mxu1 %v924_v16 }
  0x6a   : > { %797 = vmatprep.subr.bf16.mxu0 %v1066_v0  ;;  %817 = vmatprep.subr.bf16.mxu1 %v1066_v0 }
  0x6d   : > { %798 = vmatpush3.bf16.msra.mxu0 %v916_v13  ;;  %818 = vmatpush3.bf16.msra.mxu1 %v925_v17 }
  0x6e   : > { %823 = vmatprep.subr.bf16.mxu0 %v1066_v0 }
  0x70   : > { %800 = vmatmul.mubr.bf16.vlgmr.msra.gmra.mrb[0].mxu0 %v917_v15 }
  0x71   : > { %839 = vmatprep.mubr.msk.bf16.mxu0 %vm1067_vm0, %v1066_v0  ;;  %824 = vmatpush3.bf16.msra.mxu0 %v926_v18 }
  0x72   : > { %825 = vmatprep.subr.bf16.mxu0 %v1066_v0 }
  0x75   : > { %826 = vmatpush3.bf16.msra.mxu0 %v927_v19 }
  0x76   : > { %827 = vmatprep.subr.bf16.mxu0 %v1066_v0 }
  0x79   : > { %828 = vmatpush3.bf16.msra.mxu0 %v928_v20 }
  0x7a   : > { %829 = vmatprep.subr.bf16.mxu0 %v1066_v0 }
  0x7d   : > { %830 = vmatpush3.bf16.msra.mxu0 %v929_v21 }
  0x7e   : > { %831 = vmatprep.subr.bf16.mxu0 %v1066_v0 }
  0x81   : > { %832 = vmatpush3.bf16.msra.mxu0 %v930_v22 }
  0x82   : > { %833 = vmatprep.subr.bf16.mxu0 %v1066_v0 }
  0x85   : > { %834 = vmatpush3.bf16.msra.mxu0 %v931_v23 }
  0x86   : > { %835 = vmatprep.subr.bf16.mxu0 %v1066_v0 }
  0x89   : > { %836 = vmatpush3.bf16.msra.mxu0 %v932_v34 }
  0x8a   : > { %837 = vmatprep.subr.bf16.mxu0 %v1066_v0 }
  0x8d   : > { %838 = vmatpush3.bf16.msra.mxu0 %v933_v35 }
 0x143   : > { %v370_v25 = vpop.f32.mrb[0].mxu0 }
 0x144   : > { %v371_v26 = vadd.f32 %v720_v24, %v370_v25  ;;  %v801_v27 = vpop.f32.mrb[1].mxu0 }
 0x145   : > { %v373_v28 = vpop.f32.mrb[2].mxu0 }
 0x146   : > { %v374_v29 = vadd.f32 %v720_v24, %v373_v28  ;;  %v802_v30 = vpop.f32.mrb[3].mxu0  ;;  %v377_v31 = vmax.f32 %v371_v26, 0.0 }
 0x148   : > { %v378_v32 = vmax.f32 %v374_v29, 0.0 }
 0x14a   : > { %v379_v33 = vpack.c.bf16 %v378_v32, %v377_v31 }
 0x14c   : > { %820 = vmatmul.mubr.bf16.vlgmr.msra.gmra.mrb[0].mxu1 %v379_v33 }
 0x21f   : > { %v486_v37 = vpop.f32.mrb[0].mxu1 }
 0x220   : > { %v487_v38 = vadd.f32 %v731_v36, %v486_v37  ;;  %v821_v39 = vpop.f32.mrb[1].mxu1 }
 0x221   : > { %v489_v40 = vpop.f32.mrb[2].mxu1 }
 0x222   : > { %v490_v41 = vadd.f32 %v731_v36, %v489_v40  ;;  %v822_v42 = vpop.f32.mrb[3].mxu1  ;;  %v493_v43 = vmax.f32 %v487_v38, 0.0 }
 0x224   : > { %v494_v44 = vmax.f32 %v490_v41, 0.0 }
 0x226   : > { %v495_v45 = vpack.c.bf16 %v494_v44, %v493_v43 }
 0x228   : > { %840 = vmatmul.mubr.bf16.vlgmr.msra.gmra.mrb[4].mxu0 %v495_v45 }
 0x2fb   : > { %v602_v47 = vpop.f32.mrb[4].mxu0 }
 0x2fc   : > { %v603_v48 = vadd.f32 %v741_v46, %v602_v47  ;;  %v841_v49 = vpop.f32.mrb[5].mxu0 }
 0x2fd   : > { %v605_v50 = vpop.f32.mrb[6].mxu0 }
 0x2fe   : > { %609 = vst [vmem:[%s248_s7] sm:$0xff] %v603_v48  ;;  %v606_v51 = vadd.f32 %v741_v46, %v605_v50  ;;  %v842_v52 = vpop.f32.mrb[7].mxu0 }
 0x300   : > { %610 = vst [vmem:[%s248_s7 + $0x8] sm:$0xff] %v606_v51 }
 0x301   : > { %1003 = shalt.err (!%p1000_p11)
}
 0x302   : > { %s1004_s12 = scalar_lea.hbm %s1298_s10, 256  ;;  %s1008_s15 = scalar_lea.hbm %s1346_s5, 512 }
 0x303   : > { %p1005_p13 = scmp.ne.s32.totalorder %s1298_s10, %s1004_s12  ;;  %p1009_p6 = scmp.lt.u32.totalorder %s1298_s10, %s1346_s5 }
 0x304   : > { %p1010_p9 = scmp.lt.u32.totalorder %s1008_s15, %s1004_s12  ;;  %p1012_p10 = scmp.lt.u32.totalorder %s1004_s12, %s1298_s10 }
 0x305   : > { %p1006_p5 = pnand %p1005_p13, %p1359_p1 }
 0x306   : > { %p1011_p12 = por %p1010_p9, %p1009_p6 }
 0x307   : > { %p1007_p0 = pneg %p1006_p5 }
 0x308   : > { %p1013_p2 = por %p1012_p10, %p1011_p12 }
 0x30a   : > { %p1014_p3 = pnand %p1013_p2, %p1007_p0 }
 0x30c   : > { %1017 = shalt.err (!%p1014_p3)
}
 0x30d   : > { %s1069_s7 = smov 128   ;;  %s1070_s6 = smov 8  }
 0x30e   : > { %851 = dma.vmem_to_hbm [thread:$0]  (%p1359_p1), %s1293_s23, 256, %s1298_s10, %s1300_s25, %s1069_s7, %s1069_s7, %s1070_s6  }
 0x30f PF: > { %p868_p4 = scmp.ge.s32.totalorder %s1060_s21, 2  ;;  %s640_s8 = sand.u32 1, %s1048_s18  }
 0x310   : > { %p1360_p7 = scmp.ne.s32.totalorder %s1351_s29, 0  ;;  %s641_s30 = scalar_lea.sflag [#allocation4], %s640_s8 }
 0x312   : > { %p861_p8 = pnand %p868_p4, %p1360_p7 }
 0x314   : > { %1043 = dma.done.wait (!%p861_p8), %s641_s30, 256  }
 0x315   : > { %1045 = vsyncadd (!%p861_p8), %s641_s30, 4294967040  ;;  %p17_p11 = scmp.ge.s32.totalorder %s1126_s24, 4   ;;  %s1361_s18 = smov %s1052_s19 }
 0x316   : > { %s1362_s19 = smov %s1056_s20  ;;  %s1363_s20 = smov %s1137_s27 }
 0x317   : > { %s1364_s21 = smov %s1126_s24  ;;  %19 = sbr.rel (!%p17_p11) target bundleno = 5 (0x5), region = 86 }
 0x31e   :  { %646 = vsyncpa [#allocation3], 1 }
 0x31f   :  { %648 = vsyncpa [#allocation3 + $0x1], 1 }
 0x320   :  { %649 = vsyncpa [#allocation6], 1 }
 0x321   :  { %650 = vsyncpa [#allocation4], 1 }
 0x322   :  { %652 = vsyncpa [#allocation4 + $0x1], 1 }

</bundles_post_ra>
